<compile_context>
chip_gen: v6e
topology: v6e:2x2x1
jax: 0.10.0
libtpu: 0.0.40
codegen_flags: <defaults>
</compile_context>

<pallas_src>
import jax
import jax.numpy as jnp
from jax.experimental import pallas as pl
from jax.experimental.pallas import tpu as pltpu

HIDDEN = 256
OUT_LANES = 128   # lane-dense output tile; the value lives in column 0
TB = 256          # batch tile (multiple of 256 for v6e/v7x MXU, of 128 for v5e)


def _mlp_kernel(x_ref, w1_ref, b1_ref, w2_ref, b2_ref, w3_ref, b3_ref, o_ref):
    # fc1 + fc2: bf16 MXU matmuls, f32 accumulation, fused bias + ReLU on the VPU.
    x = x_ref[...].astype(jnp.bfloat16)
    h1 = jnp.dot(x, w1_ref[...], preferred_element_type=jnp.float32) + b1_ref[...]
    h1 = jnp.maximum(h1, 0.0)
    h2 = jnp.dot(h1.astype(jnp.bfloat16), w2_ref[...],
                 preferred_element_type=jnp.float32) + b2_ref[...]
    h2 = jnp.maximum(h2, 0.0)
    # fc3 (256 -> 1): VPU multiply + lane reduction (XLU) — avoids a 1-column MXU matmul.
    v = jnp.sum(h2 * w3_ref[...], axis=-1, keepdims=True) + b3_ref[0, 0]
    # Lane-dense (TB, 128) store so writeback is an unmasked, dense vst/DMA.
    o_ref[...] = jnp.broadcast_to(v, o_ref.shape).astype(o_ref.dtype)


def soft_v_network(x, params):
    """x: (B, obs_dim) float32. Returns (B, 1) float32."""
    w1, b1, w2, b2, w3, b3 = params
    B, obs_dim = x.shape

    # Pad the batch up to a multiple of the batch tile so every grid step is full.
    bp = pl.cdiv(B, TB) * TB
    if bp != B:
        x = jnp.pad(x, ((0, bp - B), (0, 0)))
    grid = (bp // TB,)

    flops = 2 * bp * (obs_dim * HIDDEN + HIDDEN * HIDDEN + HIDDEN)
    bytes_accessed = int(
        x.size * x.dtype.itemsize
        + sum(p.size * p.dtype.itemsize for p in params)
        + bp * OUT_LANES * 4
    )

    const = lambda shape: pl.BlockSpec(shape, lambda i: (0,) * len(shape))

    out = pl.pallas_call(
        _mlp_kernel,
        grid=grid,
        out_shape=jax.ShapeDtypeStruct((bp, OUT_LANES), jnp.float32),
        in_specs=[
            pl.BlockSpec((TB, obs_dim), lambda i: (i, 0)),        # x: streamed batch tiles
            const(w1.shape), const(b1.shape),                     # weights/biases stay resident
            const(w2.shape), const(b2.shape),
            const(w3.shape),
            pl.BlockSpec(memory_space=pltpu.MemorySpace.SMEM),    # b3 scalar lives in SMEM
        ],
        out_specs=pl.BlockSpec((TB, OUT_LANES), lambda i: (i, 0)),
        compiler_params=pltpu.CompilerParams(
            dimension_semantics=("parallel",)),
        cost_estimate=pl.CostEstimate(
            flops=flops, transcendentals=0, bytes_accessed=bytes_accessed),
    )(x, w1, b1, w2, b2, w3, b3)

    return out[:B, :1]


def init_params(key, obs_dim):
    """PyTorch nn.Linear-style init (uniform +-1/sqrt(fan_in)).
    Weights stored (in, out); fc1/fc2 weights stored in bf16 for the MXU,
    fc3 weight as a (1, 256) f32 row for the VPU reduction, b3 as a (1,1) scalar."""
    ks = jax.random.split(key, 6)

    def linear(kw, kb, fan_in, fan_out, w_dtype):
        bound = 1.0 / jnp.sqrt(jnp.float32(fan_in))
        w = jax.random.uniform(kw, (fan_in, fan_out), jnp.float32, -bound, bound)
        b = jax.random.uniform(kb, (1, fan_out), jnp.float32, -bound, bound)
        return w.astype(w_dtype), b

    w1, b1 = linear(ks[0], ks[1], obs_dim, HIDDEN, jnp.bfloat16)
    w2, b2 = linear(ks[2], ks[3], HIDDEN, HIDDEN, jnp.bfloat16)
    w3, b3 = linear(ks[4], ks[5], HIDDEN, 1, jnp.float32)
    w3 = w3.reshape(1, HIDDEN)   # row vector for in-kernel lane reduction
    b3 = b3.reshape(1, 1)        # scalar for SMEM
    return (w1, b1, w2, b2, w3, b3)


def reference(x, params):
    w1, b1, w2, b2, w3, b3 = params
    h = jnp.maximum(x @ w1.astype(jnp.float32) + b1, 0.0)
    h = jnp.maximum(h @ w2.astype(jnp.float32) + b2, 0.0)
    return jnp.sum(h * w3, axis=-1, keepdims=True) + b3


if __name__ == "__main__":
    B, OBS_DIM = 2, 8  # small shapes consistent with a flat observation space

    key = jax.random.PRNGKey(0)
    kx, kp = jax.random.split(key)
    x = jax.random.normal(kx, (B, OBS_DIM), jnp.float32)
    params = init_params(kp, OBS_DIM)

    out = soft_v_network(x, params)
    out = jax.block_until_ready(out)

    ref = reference(x, params)
    assert out.shape == (B, 1), out.shape
    # bf16 MXU inputs (f32 accumulation) -> loosened tolerance vs pure-f32 reference.
    assert jnp.allclose(out, ref, atol=2e-2, rtol=2e-2), (out, ref)

    print("KERNEL_OK")
</pallas_src>

<mosaic_0001>
module attributes {stable_mosaic.version = 11 : i64} {
  func.func @_mlp_kernel(%arg0: i32, %arg1: memref<256x8xf32, #tpu.memory_space<vmem>>, %arg2: memref<8x256xbf16, #tpu.memory_space<vmem>>, %arg3: memref<1x256xf32, #tpu.memory_space<vmem>>, %arg4: memref<256x256xbf16, #tpu.memory_space<vmem>>, %arg5: memref<1x256xf32, #tpu.memory_space<vmem>>, %arg6: memref<1x256xf32, #tpu.memory_space<vmem>>, %arg7: memref<1x1xf32, #tpu.memory_space<smem>>, %arg8: memref<256x128xf32, #tpu.memory_space<vmem>>) attributes {dimension_semantics = [#tpu.dimension_semantics<parallel>], iteration_bounds = array<i64: 1>, scalar_prefetch = 0 : i64, scratch_operands = 0 : i64, tpu.core_type = #tpu.core_type<tc>, window_params = [{transform_indices = @transform_0, window_bounds = array<i64: 256, 8>}, {pipeline_mode = #tpu.pipeline_mode<synchronous>, transform_indices = @transform_1, window_bounds = array<i64: 8, 256>}, {pipeline_mode = #tpu.pipeline_mode<synchronous>, transform_indices = @transform_2, window_bounds = array<i64: 1, 256>}, {pipeline_mode = #tpu.pipeline_mode<synchronous>, transform_indices = @transform_3, window_bounds = array<i64: 256, 256>}, {pipeline_mode = #tpu.pipeline_mode<synchronous>, transform_indices = @transform_4, window_bounds = array<i64: 1, 256>}, {pipeline_mode = #tpu.pipeline_mode<synchronous>, transform_indices = @transform_5, window_bounds = array<i64: 1, 256>}, {transform_indices = @transform_6, window_bounds = array<i64: 1, 1>}, {transform_indices = @transform_7, window_bounds = array<i64: 256, 128>}]} {
    %c0 = arith.constant 0 : index
    %c0_0 = arith.constant 0 : index
    %0 = vector.load %arg1[%c0, %c0_0] : memref<256x8xf32, #tpu.memory_space<vmem>>, vector<256x8xf32>
    %1 = arith.truncf %0 : vector<256x8xf32> to vector<256x8xbf16>
    %c0_1 = arith.constant 0 : index
    %c0_2 = arith.constant 0 : index
    %2 = vector.load %arg2[%c0_1, %c0_2] : memref<8x256xbf16, #tpu.memory_space<vmem>>, vector<8x256xbf16>
    %cst = arith.constant dense<0.000000e+00> : vector<256x256xf32>
    %3 = tpu.matmul %1, %2, %cst {dimension_numbers = #tpu.dot_dimension_numbers<[1], [0], [0], [1], [0, 0, 1, 1], [], []>} : vector<256x8xbf16>, vector<8x256xbf16>, vector<256x256xf32> -> vector<256x256xf32>
    %c0_3 = arith.constant 0 : index
    %c0_4 = arith.constant 0 : index
    %4 = vector.load %arg3[%c0_3, %c0_4] : memref<1x256xf32, #tpu.memory_space<vmem>>, vector<1x256xf32>
    %5 = vector.broadcast %4 : vector<1x256xf32> to vector<256x256xf32>
    %6 = arith.addf %3, %5 : vector<256x256xf32>
    %cst_5 = arith.constant 0.000000e+00 : f32
    %7 = vector.broadcast %cst_5 : f32 to vector<256x256xf32>
    %8 = arith.maximumf %6, %7 : vector<256x256xf32>
    %9 = arith.truncf %8 : vector<256x256xf32> to vector<256x256xbf16>
    %c0_6 = arith.constant 0 : index
    %c0_7 = arith.constant 0 : index
    %10 = vector.load %arg4[%c0_6, %c0_7] : memref<256x256xbf16, #tpu.memory_space<vmem>>, vector<256x256xbf16>
    %cst_8 = arith.constant dense<0.000000e+00> : vector<256x256xf32>
    %11 = tpu.matmul %9, %10, %cst_8 {dimension_numbers = #tpu.dot_dimension_numbers<[1], [0], [0], [1], [0, 0, 1, 1], [], []>} : vector<256x256xbf16>, vector<256x256xbf16>, vector<256x256xf32> -> vector<256x256xf32>
    %c0_9 = arith.constant 0 : index
    %c0_10 = arith.constant 0 : index
    %12 = vector.load %arg5[%c0_9, %c0_10] : memref<1x256xf32, #tpu.memory_space<vmem>>, vector<1x256xf32>
    %13 = vector.broadcast %12 : vector<1x256xf32> to vector<256x256xf32>
    %14 = arith.addf %11, %13 : vector<256x256xf32>
    %cst_11 = arith.constant 0.000000e+00 : f32
    %15 = vector.broadcast %cst_11 : f32 to vector<256x256xf32>
    %16 = arith.maximumf %14, %15 : vector<256x256xf32>
    %c0_12 = arith.constant 0 : index
    %c0_13 = arith.constant 0 : index
    %17 = vector.load %arg6[%c0_12, %c0_13] : memref<1x256xf32, #tpu.memory_space<vmem>>, vector<1x256xf32>
    %18 = vector.broadcast %17 : vector<1x256xf32> to vector<256x256xf32>
    %19 = arith.mulf %16, %18 : vector<256x256xf32>
    %cst_14 = arith.constant dense<0.000000e+00> : vector<256xf32>
    %20 = vector.multi_reduction <add>, %19, %cst_14 [1] : vector<256x256xf32> to vector<256xf32>
    %21 = vector.shape_cast %20 : vector<256xf32> to vector<256x1xf32>
    %c0_15 = arith.constant 0 : index
    %c0_16 = arith.constant 0 : index
    %22 = memref.load %arg7[%c0_15, %c0_16] : memref<1x1xf32, #tpu.memory_space<smem>>
    %23 = vector.broadcast %22 : f32 to vector<256x1xf32>
    %24 = arith.addf %21, %23 : vector<256x1xf32>
    %25 = vector.shape_cast %24 : vector<256x1xf32> to vector<256x1xf32>
    %26 = vector.broadcast %25 : vector<256x1xf32> to vector<256x128xf32>
    %c0_17 = arith.constant 0 : index
    %c0_18 = arith.constant 0 : index
    %27 = vector.load %arg8[%c0_17, %c0_18] : memref<256x128xf32, #tpu.memory_space<vmem>>, vector<256x128xf32>
    tpu.vector_store %arg8[%c0_17, %c0_18], %26 {strides = array<i32>} : memref<256x128xf32, #tpu.memory_space<vmem>>, vector<256x128xf32>,
    return
  }
  func.func @transform_0(%arg0: i32) -> (i32, i32) {
    %c0_i32 = arith.constant 0 : i32
    %c0_i32_0 = arith.constant 0 : i32
    return %arg0, %c0_i32 : i32, i32
  }
  func.func @transform_1(%arg0: i32) -> (i32, i32) {
    %c0_i32 = arith.constant 0 : i32
    %c0_i32_0 = arith.constant 0 : i32
    %c0_i32_1 = arith.constant 0 : i32
    return %c0_i32, %c0_i32_0 : i32, i32
  }
  func.func @transform_2(%arg0: i32) -> (i32, i32) {
    %c0_i32 = arith.constant 0 : i32
    %c0_i32_0 = arith.constant 0 : i32
    %c0_i32_1 = arith.constant 0 : i32
    return %c0_i32, %c0_i32_0 : i32, i32
  }
  func.func @transform_3(%arg0: i32) -> (i32, i32) {
    %c0_i32 = arith.constant 0 : i32
    %c0_i32_0 = arith.constant 0 : i32
    %c0_i32_1 = arith.constant 0 : i32
    return %c0_i32, %c0_i32_0 : i32, i32
  }
  func.func @transform_4(%arg0: i32) -> (i32, i32) {
    %c0_i32 = arith.constant 0 : i32
    %c0_i32_0 = arith.constant 0 : i32
    %c0_i32_1 = arith.constant 0 : i32
    return %c0_i32, %c0_i32_0 : i32, i32
  }
  func.func @transform_5(%arg0: i32) -> (i32, i32) {
    %c0_i32 = arith.constant 0 : i32
    %c0_i32_0 = arith.constant 0 : i32
    %c0_i32_1 = arith.constant 0 : i32
    return %c0_i32, %c0_i32_0 : i32, i32
  }
  func.func @transform_6(%arg0: i32) -> (i32, i32) {
    %c0_i32 = arith.constant 0 : i32
    %c0_i32_0 = arith.constant 0 : i32
    %c0_i32_1 = arith.constant 0 : i32
    return %c0_i32, %c0_i32_0 : i32, i32
  }
  func.func @transform_7(%arg0: i32) -> (i32, i32) {
    %c0_i32 = arith.constant 0 : i32
    %c0_i32_0 = arith.constant 0 : i32
    return %arg0, %c0_i32 : i32, i32
  }
}

</mosaic_0001>

<bundles_post_ra>
// kernel: tpu_custom_call.1
= control target key start
LH: loop header
LB: loop body
LE: loop exit
PB: predicated region body
PF: predicated region fallthrough
CT: control target
= control target key end

     0   :  { %vm144_vm0 = vcmask 1043456   ;;  %v1314_v5 = vmov 0   ;;  %vm95_vm1 = vcmask 64512   ;;  %s1848_s0 = inlined_call_operand.vmem [shape: f32[256,8], index: 0, kind: input, shape index: {}]   ;;  %s1849_s1 = inlined_call_operand.vmem [shape: bf16[8,256], index: 1, kind: input, shape index: {}]   ;;  %s1850_s2 = inlined_call_operand.vmem [shape: f32[1,256], index: 2, kind: input, shape index: {}]   ;;  %s1851_s3 = inlined_call_operand.vmem [shape: bf16[256,256], index: 3, kind: input, shape index: {}]   ;;  %s1852_s4 = inlined_call_operand.vmem [shape: f32[1,256], index: 4, kind: input, shape index: {}]   ;;  %s1853_s5 = inlined_call_operand.vmem [shape: f32[1,256], index: 5, kind: input, shape index: {}]   ;;  %s1854_s6 = inlined_call_operand.<no memory space> [shape: f32[1,1], index: 6, kind: input, shape index: {}]   ;;  %s1855_s7 = inlined_call_operand.hbm [shape: f32[256,128], index: 7, kind: output, shape index: {}]  }
   0x1   :  { %v77_v0 = vld [vmem:[%s1849_s1] sm:$0xff]  ;;  %v30_v2 = vld [vmem:[%s1848_s0 + $0x8] sm:$0xff]  ;;  %183 = vmatprep.mubr.bf16.mxu0 %v1314_v5  ;;  %v31_v8 = vld [vmem:[%s1848_s0 + $0x10] sm:$0xff] }
   0x2   :  { %v29_v1 = vld [vmem:[%s1848_s0] sm:$0xff]  ;;  %v1156_v3 = vcombine.high %v77_v0, %v77_v0  ;;  %v1155_v4 = vcombine.low %v77_v0, %v77_v0  ;;  %v32_v9 = vld [vmem:[%s1848_s0 + $0x18] sm:$0xff]  ;;  %v34_v15 = vld [vmem:[%s1848_s0 + $0x28] sm:$0xff] }
   0x3   :  { %v61_v7 = vpack.c.bf16 %v30_v2, %v29_v1  ;;  %v62_v10 = vpack.c.bf16 %v32_v9, %v31_v8  ;;  %v1244_v11 = vld [vmem:[%s1851_s3 + $0x70] ss:$8 sps:$4 sm:$0xff]   ;;  %v1246_v12 = vld [vmem:[%s1851_s3 + $0x74] ss:$8 sps:$4 sm:$0xff]   ;;  %v1249_v13 = vld [vmem:[%s1851_s3 + $0x64] ss:$8 sps:$4 sm:$0xff]  }
   0x4   :  { %1157 = vmatprep.subr.msk.bf16.mxu0 %vm144_vm0, %v1156_v3  ;;  %v146_v6 = vsel %vm144_vm0, %v1155_v4, 0  ;;  %v33_v14 = vld [vmem:[%s1848_s0 + $0x20] sm:$0xff]  ;;  %1206 = vmatprep.subr.bf16.mxu1 %v1246_v12  ;;  %v1252_v17 = vld [vmem:[%s1851_s3 + $0x54] ss:$8 sps:$4 sm:$0xff]   ;;  %v1250_v19 = vld [vmem:[%s1851_s3 + $0x50] ss:$8 sps:$4 sm:$0xff]  }
   0x5   :  { %166 = vmatpush1.bf16.msra.mxu0 %v146_v6  ;;  %1222 = vmatpush1.bf16.msra.mxu1 %v1244_v11  ;;  %v1247_v16 = vld [vmem:[%s1851_s3 + $0x60] ss:$8 sps:$4 sm:$0xff]   ;;  %v63_v18 = vpack.c.bf16 %v34_v15, %v33_v14  ;;  %v1255_v20 = vld [vmem:[%s1851_s3 + $0x44] ss:$8 sps:$4 sm:$0xff]   ;;  %v35_v21 = vld [vmem:[%s1848_s0 + $0x30] sm:$0xff] }
   0x6   :  { %644 = vmatprep.subr.bf16.mxu0 %v1246_v12  ;;  %1207 = vmatprep.subr.bf16.mxu1 %v1249_v13  ;;  %v36_v22 = vld [vmem:[%s1848_s0 + $0x38] sm:$0xff]  ;;  %v1253_v23 = vld [vmem:[%s1851_s3 + $0x40] ss:$8 sps:$4 sm:$0xff]   ;;  %v1261_v27 = vld [vmem:[%s1851_s3 + $0x24] ss:$8 sps:$4 sm:$0xff]  }
   0x7   :  { %v1258_v24 = vld [vmem:[%s1851_s3 + $0x34] ss:$8 sps:$4 sm:$0xff]   ;;  %v64_v25 = vpack.c.bf16 %v36_v22, %v35_v21  ;;  %v1256_v26 = vld [vmem:[%s1851_s3 + $0x30] ss:$8 sps:$4 sm:$0xff]  }
   0x8   :  { %1158 = vmatmul.mubr.msk.bf16.vlgmr.msra.gmra.mxu0 %vm95_vm1, %v61_v7 }
   0x9   :  { %193 = vmatprep.mubr.bf16.mxu0 %v1314_v5  ;;  %645 = vmatpush1.bf16.msra.mxu0 %v1244_v11 }
   0xa   :  { %646 = vmatprep.subr.bf16.mxu0 %v1249_v13  ;;  %1223 = vmatpush1.bf16.msra.mxu1 %v1247_v16 }
   0xb   :  { %1208 = vmatprep.subr.bf16.mxu1 %v1252_v17 }
   0xd   :  { %647 = vmatpush1.bf16.msra.mxu0 %v1247_v16 }
   0xe   :  { %648 = vmatprep.subr.bf16.mxu0 %v1252_v17  ;;  %1224 = vmatpush1.bf16.msra.mxu1 %v1250_v19 }
   0xf   :  { %1209 = vmatprep.subr.bf16.mxu1 %v1255_v20 }
  0x10   :  { %1159 = vmatmul.mubr.msk.bf16.gmra.mxu0 %vm95_vm1, %v62_v10 }
  0x11   :  { %203 = vmatprep.mubr.bf16.mxu0 %v1314_v5  ;;  %649 = vmatpush1.bf16.msra.mxu0 %v1250_v19 }
  0x12   :  { %650 = vmatprep.subr.bf16.mxu0 %v1255_v20  ;;  %1225 = vmatpush1.bf16.msra.mxu1 %v1253_v23 }
  0x13   :  { %1210 = vmatprep.subr.bf16.mxu1 %v1258_v24 }
  0x15   :  { %651 = vmatpush1.bf16.msra.mxu0 %v1253_v23 }
  0x16   :  { %652 = vmatprep.subr.bf16.mxu0 %v1258_v24 }
  0x18   :  { %1160 = vmatmul.mubr.msk.bf16.gmra.mxu0 %vm95_vm1, %v63_v18 }
  0x19   :  { %213 = vmatprep.mubr.bf16.mxu0 %v1314_v5 }
  0x1a   :  { %13 = vsyncpa [#allocation4], 0  ;;  %1226 = vmatpush1.bf16.msra.mxu1 %v1256_v26  ;;  %v37_v28 = vld [vmem:[%s1848_s0 + $0x40] sm:$0xff]  ;;  %v38_v29 = vld [vmem:[%s1848_s0 + $0x48] sm:$0xff]  ;;  %653 = vmatpush1.bf16.msra.mxu0 %v1256_v26  ;;  %v80_v22 = vlaneseq }
  0x1b   :  { %v1259_v30 = vld [vmem:[%s1851_s3 + $0x20] ss:$8 sps:$4 sm:$0xff]   ;;  %654 = vmatprep.subr.bf16.mxu0 %v1261_v27  ;;  %v1264_v31 = vld [vmem:[%s1851_s3 + $0x14] ss:$8 sps:$4 sm:$0xff]   ;;  %1211 = vmatprep.subr.bf16.mxu1 %v1261_v27  ;;  %v65_v32 = vpack.c.bf16 %v38_v29, %v37_v28  ;;  %v1262_v33 = vld [vmem:[%s1851_s3 + $0x10] ss:$8 sps:$4 sm:$0xff]  }
  0x1c   :  { %v1267_v34 = vld [vmem:[%s1851_s3 + $0x4] ss:$8 sps:$4 sm:$0xff]   ;;  %v39_v35 = vld [vmem:[%s1848_s0 + $0x50] sm:$0xff]  ;;  %v40_v36 = vld [vmem:[%s1848_s0 + $0x58] sm:$0xff]  ;;  %v81_v23 = vshrl.u32 %v80_v22, 7 }
  0x1d   :  { %v1265_v37 = vld [vmem:[%s1851_s3] ss:$8 sps:$4 sm:$0xff]   ;;  %v1270_v38 = vld [vmem:[%s1851_s3 + $0xf4] ss:$8 sps:$4 sm:$0xff]   ;;  %v66_v39 = vpack.c.bf16 %v40_v36, %v39_v35  ;;  %v1268_v40 = vld [vmem:[%s1851_s3 + $0xf0] ss:$8 sps:$4 sm:$0xff]  }
  0x1e   :  { %1227 = vmatpush1.bf16.msra.mxu1 %v1259_v30  ;;  %655 = vmatpush1.bf16.msra.mxu0 %v1259_v30  ;;  %v1273_v41 = vld [vmem:[%s1851_s3 + $0xe4] ss:$8 sps:$4 sm:$0xff]   ;;  %v1271_v44 = vld [vmem:[%s1851_s3 + $0xe0] ss:$8 sps:$4 sm:$0xff]   ;;  %v1276_v45 = vld [vmem:[%s1851_s3 + $0xd4] ss:$8 sps:$4 sm:$0xff]  }
  0x1f   :  { %1212 = vmatprep.subr.bf16.mxu1 %v1264_v31  ;;  %656 = vmatprep.subr.bf16.mxu0 %v1264_v31  ;;  %v41_v42 = vld [vmem:[%s1848_s0 + $0x60] sm:$0xff]  ;;  %v42_v43 = vld [vmem:[%s1848_s0 + $0x68] sm:$0xff]  ;;  %v1274_v47 = vld [vmem:[%s1851_s3 + $0xd0] ss:$8 sps:$4 sm:$0xff]   ;;  %v1585_v24 = vsub.s32 1, %v81_v23 }
  0x20   :  { %1161 = vmatmul.mubr.msk.bf16.gmra.mxu0 %vm95_vm1, %v64_v25  ;;  %v67_v46 = vpack.c.bf16 %v42_v43, %v41_v42  ;;  %v1279_v48 = vld [vmem:[%s1851_s3 + $0xc4] ss:$8 sps:$4 sm:$0xff]   ;;  %v43_v49 = vld [vmem:[%s1848_s0 + $0x70] sm:$0xff]  ;;  %v44_v50 = vld [vmem:[%s1848_s0 + $0x78] sm:$0xff]  ;;  %v1587_v25 = vsub.s32 0, %v81_v23 }
  0x21   :  { %223 = vmatprep.mubr.bf16.mxu0 %v1314_v5  ;;  %v1277_v51 = vld [vmem:[%s1851_s3 + $0xc0] ss:$8 sps:$4 sm:$0xff]   ;;  %v1282_v52 = vld [vmem:[%s1851_s3 + $0xb4] ss:$8 sps:$4 sm:$0xff]   ;;  %v68_v53 = vpack.c.bf16 %v44_v50, %v43_v49  ;;  %v1280_v54 = vld [vmem:[%s1851_s3 + $0xb0] ss:$8 sps:$4 sm:$0xff]  }
  0x22   :  { %1228 = vmatpush1.bf16.msra.mxu1 %v1262_v33  ;;  %657 = vmatpush1.bf16.msra.mxu0 %v1262_v33  ;;  %v45_v55 = vld [vmem:[%s1848_s0 + $0x80] sm:$0xff]  ;;  %v46_v56 = vld [vmem:[%s1848_s0 + $0x88] sm:$0xff]  ;;  %v47_v59 = vld [vmem:[%s1848_s0 + $0x90] sm:$0xff] }
  0x23   :  { %658 = vmatprep.subr.bf16.mxu0 %v1267_v34  ;;  %1213 = vmatprep.subr.bf16.mxu1 %v1267_v34  ;;  %v69_v57 = vpack.c.bf16 %v46_v56, %v45_v55  ;;  %v1285_v58 = vld [vmem:[%s1851_s3 + $0xa4] ss:$8 sps:$4 sm:$0xff]   ;;  %v48_v60 = vld [vmem:[%s1848_s0 + $0x98] sm:$0xff]  ;;  %v1283_v61 = vld [vmem:[%s1851_s3 + $0xa0] ss:$8 sps:$4 sm:$0xff]  }
  0x24   :  { %v70_v62 = vpack.c.bf16 %v48_v60, %v47_v59  ;;  %v1288_v63 = vld [vmem:[%s1851_s3 + $0x94] ss:$8 sps:$4 sm:$0xff]   ;;  %v1286_v0 = vld [vmem:[%s1851_s3 + $0x90] ss:$8 sps:$4 sm:$0xff]   ;;  %v1291_v1 = vld [vmem:[%s1851_s3 + $0x84] ss:$8 sps:$4 sm:$0xff]  }
  0x25   :  { %v49_v2 = vld [vmem:[%s1848_s0 + $0xa0] sm:$0xff]  ;;  %v50_v3 = vld [vmem:[%s1848_s0 + $0xa8] sm:$0xff]  ;;  %v51_v7 = vld [vmem:[%s1848_s0 + $0xb0] sm:$0xff] }
  0x26   :  { %1229 = vmatpush1.bf16.msra.mxu1 %v1265_v37  ;;  %659 = vmatpush1.bf16.msra.mxu0 %v1265_v37  ;;  %v1289_v4 = vld [vmem:[%s1851_s3 + $0x80] ss:$8 sps:$4 sm:$0xff]   ;;  %v71_v6 = vpack.c.bf16 %v50_v3, %v49_v2  ;;  %v52_v8 = vld [vmem:[%s1848_s0 + $0xb8] sm:$0xff]  ;;  %v55_v13 = vld [vmem:[%s1848_s0 + $0xd0] sm:$0xff] }
  0x27   :  { %1214 = vmatprep.subr.bf16.mxu1 %v1270_v38  ;;  %660 = vmatprep.subr.bf16.mxu0 %v1270_v38  ;;  %v72_v9 = vpack.c.bf16 %v52_v8, %v51_v7  ;;  %v53_v10 = vld [vmem:[%s1848_s0 + $0xc0] sm:$0xff]  ;;  %v54_v11 = vld [vmem:[%s1848_s0 + $0xc8] sm:$0xff]  ;;  %v56_v14 = vld [vmem:[%s1848_s0 + $0xd8] sm:$0xff] }
  0x28   :  { %1162 = vmatmul.mubr.msk.bf16.gmra.mxu0 %vm95_vm1, %v65_v32  ;;  %v73_v12 = vpack.c.bf16 %v54_v11, %v53_v10  ;;  %v74_v15 = vpack.c.bf16 %v56_v14, %v55_v13  ;;  %v57_v16 = vld [vmem:[%s1848_s0 + $0xe0] sm:$0xff]  ;;  %v58_v17 = vld [vmem:[%s1848_s0 + $0xe8] sm:$0xff]  ;;  %v59_v19 = vld [vmem:[%s1848_s0 + $0xf0] sm:$0xff] }
  0x29   :  { %233 = vmatprep.mubr.bf16.mxu0 %v1314_v5  ;;  %v75_v18 = vpack.c.bf16 %v58_v17, %v57_v16  ;;  %v60_v20 = vld [vmem:[%s1848_s0 + $0xf8] sm:$0xff] }
  0x2a   :  { %1230 = vmatpush2.bf16.msra.mxu1 %v1268_v40  ;;  %661 = vmatpush2.bf16.msra.mxu0 %v1268_v40  ;;  %v76_v21 = vpack.c.bf16 %v60_v20, %v59_v19 }
  0x2b   :  { %662 = vmatprep.subr.bf16.mxu0 %v1273_v41  ;;  %1215 = vmatprep.subr.bf16.mxu1 %v1273_v41 }
  0x2e   :  { %1231 = vmatpush2.bf16.msra.mxu1 %v1271_v44  ;;  %663 = vmatpush2.bf16.msra.mxu0 %v1271_v44 }
  0x2f   :  { %1216 = vmatprep.subr.bf16.mxu1 %v1276_v45  ;;  %664 = vmatprep.subr.bf16.mxu0 %v1276_v45 }
  0x30   :  { %1163 = vmatmul.mubr.msk.bf16.gmra.mxu0 %vm95_vm1, %v66_v39 }
  0x31   :  { %243 = vmatprep.mubr.bf16.mxu0 %v1314_v5 }
  0x32   :  { %1232 = vmatpush2.bf16.msra.mxu1 %v1274_v47  ;;  %665 = vmatpush2.bf16.msra.mxu0 %v1274_v47 }
  0x33   :  { %666 = vmatprep.subr.bf16.mxu0 %v1279_v48  ;;  %1217 = vmatprep.subr.bf16.mxu1 %v1279_v48 }
  0x36   :  { %1233 = vmatpush2.bf16.msra.mxu1 %v1277_v51  ;;  %667 = vmatpush2.bf16.msra.mxu0 %v1277_v51 }
  0x37   :  { %1218 = vmatprep.subr.bf16.mxu1 %v1282_v52  ;;  %668 = vmatprep.subr.bf16.mxu0 %v1282_v52 }
  0x38   :  { %1164 = vmatmul.mubr.msk.bf16.gmra.mxu0 %vm95_vm1, %v67_v46 }
  0x39   :  { %253 = vmatprep.mubr.bf16.mxu0 %v1314_v5 }
  0x3a   :  { %1234 = vmatpush2.bf16.msra.mxu1 %v1280_v54  ;;  %669 = vmatpush2.bf16.msra.mxu0 %v1280_v54 }
  0x3b   :  { %670 = vmatprep.subr.bf16.mxu0 %v1285_v58  ;;  %1219 = vmatprep.subr.bf16.mxu1 %v1285_v58 }
  0x3e   :  { %671 = vmatpush2.bf16.msra.mxu0 %v1283_v61  ;;  %1235 = vmatpush2.bf16.msra.mxu1 %v1283_v61 }
  0x3f   :  { %672 = vmatprep.subr.bf16.mxu0 %v1288_v63  ;;  %1220 = vmatprep.subr.bf16.mxu1 %v1288_v63 }
  0x40   :  { %1165 = vmatmul.mubr.msk.bf16.gmra.mxu0 %vm95_vm1, %v68_v53 }
  0x41   :  { %263 = vmatprep.mubr.bf16.mxu0 %v1314_v5 }
  0x42   :  { %673 = vmatpush2.bf16.msra.mxu0 %v1286_v0  ;;  %1236 = vmatpush2.bf16.msra.mxu1 %v1286_v0 }
  0x43   :  { %674 = vmatprep.subr.bf16.mxu0 %v1291_v1  ;;  %1221 = vmatprep.subr.bf16.mxu1 %v1291_v1 }
  0x46   :  { %675 = vmatpush2.bf16.msra.mxu0 %v1289_v4  ;;  %1237 = vmatpush2.bf16.msra.mxu1 %v1289_v4 }
  0x48   :  { %1166 = vmatmul.mubr.msk.bf16.gmra.mxu0 %vm95_vm1, %v69_v57 }
  0x49   :  { %273 = vmatprep.mubr.bf16.mxu0 %v1314_v5 }
  0x50   :  { %1167 = vmatmul.mubr.msk.bf16.gmra.mxu0 %vm95_vm1, %v70_v62 }
  0x51   :  { %283 = vmatprep.mubr.bf16.mxu0 %v1314_v5 }
  0x58   :  { %1168 = vmatmul.mubr.msk.bf16.gmra.mxu0 %vm95_vm1, %v71_v6 }
  0x59   :  { %293 = vmatprep.mubr.bf16.mxu0 %v1314_v5 }
  0x60   :  { %1169 = vmatmul.mubr.msk.bf16.gmra.mxu0 %vm95_vm1, %v72_v9 }
  0x61   :  { %303 = vmatprep.mubr.bf16.mxu0 %v1314_v5 }
  0x68   :  { %1170 = vmatmul.mubr.msk.bf16.gmra.mxu0 %vm95_vm1, %v73_v12 }
  0x69   :  { %313 = vmatprep.mubr.bf16.mxu0 %v1314_v5 }
  0x70   :  { %1171 = vmatmul.mubr.msk.bf16.gmra.mxu0 %vm95_vm1, %v74_v15 }
  0x71   :  { %323 = vmatprep.mubr.bf16.mxu0 %v1314_v5 }
  0x78   :  { %1172 = vmatmul.mubr.msk.bf16.gmra.mxu0 %vm95_vm1, %v75_v18 }
  0x79   :  { %333 = vmatprep.mubr.bf16.mxu0 %v1314_v5  ;;  %v78_v5 = vld [vmem:[%s1850_s2] sm:$0x3] }
  0x7a   :  { %v1593_v27 = vrot.slane %v78_v5, %v1585_v24  ;;  %v1596_v28 = vrot.slane %v78_v5, %v1587_v25 }
  0x80   :  { %1173 = vmatmul.mubr.msk.bf16.gmra.mxu0 %vm95_vm1, %v76_v21 }
  0xc8   :  { %v185_v26 = vpop.f32.mrf.mxu0 }
  0xc9   :  { %v186_v33 = vadd.f32 %v185_v26, %v1596_v28 }
  0xca   :  { %v187_v29 = vpop.f32.mrf.mxu0 }
  0xcb   :  { %v188_v31 = vadd.f32 %v187_v29, %v1593_v27  ;;  %v344_v40 = vmax.f32 %v186_v33, 0.0 }
  0xcc   :  { %v189_v30 = vpop.f32.mrf.mxu0 }
  0xcd   :  { %v190_v32 = vadd.f32 %v189_v30, %v1596_v28  ;;  %v345_v38 = vmax.f32 %v188_v31, 0.0 }
  0xce   :  { %v191_v34 = vpop.f32.mrf.mxu0 }
  0xcf   :  { %v192_v35 = vadd.f32 %v191_v34, %v1593_v27  ;;  %v346_v36 = vmax.f32 %v190_v32, 0.0 }
  0xd0   :  { %v195_v37 = vpop.f32.mrf.mxu0 }
  0xd1   :  { %v347_v39 = vmax.f32 %v192_v35, 0.0  ;;  %v408_v43 = vpack.c.bf16 %v346_v36, %v344_v40  ;;  %v196_v47 = vadd.f32 %v195_v37, %v1596_v28 }
  0xd2   :  { %v197_v41 = vpop.f32.mrf.mxu0 }
  0xd3   :  { %v409_v42 = vpack.c.bf16 %v347_v39, %v345_v38  ;;  %v198_v45 = vadd.f32 %v197_v41, %v1593_v27  ;;  %v348_v54 = vmax.f32 %v196_v47, 0.0 }
  0xd4   :  { %v199_v44 = vpop.f32.mrf.mxu0 }
  0xd5   :  { %v200_v46 = vadd.f32 %v199_v44, %v1596_v28  ;;  %676 = vmatprep.mubr.bf16.mxu0 %v409_v42  ;;  %v349_v52 = vmax.f32 %v198_v45, 0.0 }
  0xd6   :  { %v201_v48 = vpop.f32.mrf.mxu0  ;;  %677 = vmatmul.mubr.bf16.vlgmr.msra.gmra.mxu0 %v408_v43 }
  0xd7   :  { %v202_v49 = vadd.f32 %v201_v48, %v1593_v27  ;;  %v350_v50 = vmax.f32 %v200_v46, 0.0 }
  0xd8   :  { %v205_v51 = vpop.f32.mrf.mxu0 }
  0xd9   :  { %v351_v53 = vmax.f32 %v202_v49, 0.0  ;;  %v410_v57 = vpack.c.bf16 %v350_v50, %v348_v54  ;;  %v206_v61 = vadd.f32 %v205_v51, %v1596_v28 }
  0xda   :  { %v207_v55 = vpop.f32.mrf.mxu0 }
  0xdb   :  { %v411_v56 = vpack.c.bf16 %v351_v53, %v349_v52  ;;  %v208_v59 = vadd.f32 %v207_v55, %v1593_v27  ;;  %v352_v4 = vmax.f32 %v206_v61, 0.0 }
  0xdc   :  { %v209_v58 = vpop.f32.mrf.mxu0 }
  0xdd   :  { %v210_v60 = vadd.f32 %v209_v58, %v1596_v28  ;;  %686 = vmatprep.mubr.bf16.mxu0 %v411_v56  ;;  %v353_v2 = vmax.f32 %v208_v59, 0.0 }
  0xde   :  { %v211_v62 = vpop.f32.mrf.mxu0  ;;  %687 = vmatmul.mubr.bf16.gmra.mxu0 %v410_v57 }
  0xdf   :  { %v212_v63 = vadd.f32 %v211_v62, %v1593_v27  ;;  %v354_v0 = vmax.f32 %v210_v60, 0.0 }
  0xe0   :  { %v215_v1 = vpop.f32.mrf.mxu0 }
  0xe1   :  { %v355_v3 = vmax.f32 %v212_v63, 0.0  ;;  %v412_v8 = vpack.c.bf16 %v354_v0, %v352_v4  ;;  %v216_v12 = vadd.f32 %v215_v1, %v1596_v28 }
  0xe2   :  { %v217_v6 = vpop.f32.mrf.mxu0 }
  0xe3   :  { %v413_v7 = vpack.c.bf16 %v355_v3, %v353_v2  ;;  %v218_v10 = vadd.f32 %v217_v6, %v1593_v27  ;;  %v356_v19 = vmax.f32 %v216_v12, 0.0 }
  0xe4   :  { %v219_v9 = vpop.f32.mrf.mxu0 }
  0xe5   :  { %v220_v11 = vadd.f32 %v219_v9, %v1596_v28  ;;  %696 = vmatprep.mubr.bf16.mxu0 %v413_v7  ;;  %v357_v17 = vmax.f32 %v218_v10, 0.0 }
  0xe6   :  { %v221_v13 = vpop.f32.mrf.mxu0  ;;  %697 = vmatmul.mubr.bf16.gmra.mxu0 %v412_v8 }
  0xe7   :  { %v222_v14 = vadd.f32 %v221_v13, %v1593_v27  ;;  %v358_v15 = vmax.f32 %v220_v11, 0.0 }
  0xe8   :  { %v225_v16 = vpop.f32.mrf.mxu0 }
  0xe9   :  { %v359_v18 = vmax.f32 %v222_v14, 0.0  ;;  %v414_v22 = vpack.c.bf16 %v358_v15, %v356_v19  ;;  %v226_v29 = vadd.f32 %v225_v16, %v1596_v28 }
  0xea   :  { %v227_v20 = vpop.f32.mrf.mxu0 }
  0xeb   :  { %v415_v21 = vpack.c.bf16 %v359_v18, %v357_v17  ;;  %v228_v5 = vadd.f32 %v227_v20, %v1593_v27  ;;  %v360_v36 = vmax.f32 %v226_v29, 0.0 }
  0xec   :  { %v229_v23 = vpop.f32.mrf.mxu0 }
  0xed   :  { %v230_v26 = vadd.f32 %v229_v23, %v1596_v28  ;;  %706 = vmatprep.mubr.bf16.mxu1 %v415_v21  ;;  %v361_v34 = vmax.f32 %v228_v5, 0.0 }
  0xee   :  { %v231_v30 = vpop.f32.mrf.mxu0  ;;  %707 = vmatmul.mubr.bf16.vlgmr.msra.gmra.mxu1 %v414_v22 }
  0xef   :  { %v232_v31 = vadd.f32 %v231_v30, %v1593_v27  ;;  %v362_v32 = vmax.f32 %v230_v26, 0.0 }
  0xf0   :  { %v235_v33 = vpop.f32.mrf.mxu0 }
  0xf1   :  { %v363_v35 = vmax.f32 %v232_v31, 0.0  ;;  %v416_v39 = vpack.c.bf16 %v362_v32, %v360_v36  ;;  %v236_v43 = vadd.f32 %v235_v33, %v1596_v28 }
  0xf2   :  { %v237_v37 = vpop.f32.mrf.mxu0 }
  0xf3   :  { %v417_v38 = vpack.c.bf16 %v363_v35, %v361_v34  ;;  %v238_v41 = vadd.f32 %v237_v37, %v1593_v27  ;;  %v364_v50 = vmax.f32 %v236_v43, 0.0 }
  0xf4   :  { %v239_v40 = vpop.f32.mrf.mxu0 }
  0xf5   :  { %v240_v42 = vadd.f32 %v239_v40, %v1596_v28  ;;  %716 = vmatprep.mubr.bf16.mxu1 %v417_v38  ;;  %v365_v48 = vmax.f32 %v238_v41, 0.0 }
  0xf6   :  { %v241_v44 = vpop.f32.mrf.mxu0  ;;  %717 = vmatmul.mubr.bf16.gmra.mxu1 %v416_v39 }
  0xf7   :  { %v242_v45 = vadd.f32 %v241_v44, %v1593_v27  ;;  %v366_v46 = vmax.f32 %v240_v42, 0.0 }
  0xf8   :  { %v245_v47 = vpop.f32.mrf.mxu0 }
  0xf9   :  { %v367_v49 = vmax.f32 %v242_v45, 0.0  ;;  %v418_v53 = vpack.c.bf16 %v366_v46, %v364_v50  ;;  %v246_v57 = vadd.f32 %v245_v47, %v1596_v28 }
  0xfa   :  { %v247_v51 = vpop.f32.mrf.mxu0 }
  0xfb   :  { %v419_v52 = vpack.c.bf16 %v367_v49, %v365_v48  ;;  %v248_v55 = vadd.f32 %v247_v51, %v1593_v27  ;;  %v368_v0 = vmax.f32 %v246_v57, 0.0 }
  0xfc   :  { %v249_v54 = vpop.f32.mrf.mxu0 }
  0xfd   :  { %v250_v56 = vadd.f32 %v249_v54, %v1596_v28  ;;  %726 = vmatprep.mubr.bf16.mxu1 %v419_v52  ;;  %v369_v62 = vmax.f32 %v248_v55, 0.0 }
  0xfe   :  { %v251_v58 = vpop.f32.mrf.mxu0  ;;  %727 = vmatmul.mubr.bf16.gmra.mxu1 %v418_v53 }
  0xff   :  { %v252_v59 = vadd.f32 %v251_v58, %v1593_v27  ;;  %v370_v60 = vmax.f32 %v250_v56, 0.0 }
 0x100   :  { %v255_v61 = vpop.f32.mrf.mxu0 }
 0x101   :  { %v371_v63 = vmax.f32 %v252_v59, 0.0  ;;  %v420_v3 = vpack.c.bf16 %v370_v60, %v368_v0  ;;  %v256_v8 = vadd.f32 %v255_v61, %v1596_v28 }
 0x102   :  { %v257_v1 = vpop.f32.mrf.mxu0 }
 0x103   :  { %v421_v2 = vpack.c.bf16 %v371_v63, %v369_v62  ;;  %v258_v6 = vadd.f32 %v257_v1, %v1593_v27  ;;  %v372_v15 = vmax.f32 %v256_v8, 0.0 }
 0x104   :  { %v259_v4 = vpop.f32.mrf.mxu0 }
 0x105   :  { %v260_v7 = vadd.f32 %v259_v4, %v1596_v28  ;;  %736 = vmatprep.mubr.bf16.mxu1 %v421_v2  ;;  %v373_v13 = vmax.f32 %v258_v6, 0.0 }
 0x106   :  { %v261_v9 = vpop.f32.mrf.mxu0  ;;  %737 = vmatmul.mubr.bf16.gmra.mxu1 %v420_v3 }
 0x107   :  { %v262_v10 = vadd.f32 %v261_v9, %v1593_v27  ;;  %v374_v11 = vmax.f32 %v260_v7, 0.0 }
 0x108   :  { %v265_v12 = vpop.f32.mrf.mxu0 }
 0x109   :  { %v375_v14 = vmax.f32 %v262_v10, 0.0  ;;  %v422_v18 = vpack.c.bf16 %v374_v11, %v372_v15  ;;  %v266_v22 = vadd.f32 %v265_v12, %v1596_v28 }
 0x10a   :  { %v267_v16 = vpop.f32.mrf.mxu0 }
 0x10b   :  { %v423_v17 = vpack.c.bf16 %v375_v14, %v373_v13  ;;  %v268_v20 = vadd.f32 %v267_v16, %v1593_v27  ;;  %v376_v32 = vmax.f32 %v266_v22, 0.0 }
 0x10c   :  { %v269_v19 = vpop.f32.mrf.mxu0 }
 0x10d   :  { %v270_v21 = vadd.f32 %v269_v19, %v1596_v28  ;;  %746 = vmatprep.mubr.bf16.mxu1 %v423_v17  ;;  %v377_v30 = vmax.f32 %v268_v20, 0.0 }
 0x10e   :  { %v271_v23 = vpop.f32.mrf.mxu0  ;;  %747 = vmatmul.mubr.bf16.gmra.mxu1 %v422_v18 }
 0x10f   :  { %v272_v5 = vadd.f32 %v271_v23, %v1593_v27  ;;  %v378_v26 = vmax.f32 %v270_v21, 0.0 }
 0x110   :  { %v275_v29 = vpop.f32.mrf.mxu0 }
 0x111   :  { %v379_v31 = vmax.f32 %v272_v5, 0.0  ;;  %v424_v35 = vpack.c.bf16 %v378_v26, %v376_v32  ;;  %v276_v39 = vadd.f32 %v275_v29, %v1596_v28 }
 0x112   :  { %v277_v33 = vpop.f32.mrf.mxu0 }
 0x113   :  { %v425_v34 = vpack.c.bf16 %v379_v31, %v377_v30  ;;  %v278_v37 = vadd.f32 %v277_v33, %v1593_v27  ;;  %v380_v46 = vmax.f32 %v276_v39, 0.0 }
 0x114   :  { %v279_v36 = vpop.f32.mrf.mxu0 }
 0x115   :  { %v280_v38 = vadd.f32 %v279_v36, %v1596_v28  ;;  %756 = vmatprep.mubr.bf16.mxu1 %v425_v34  ;;  %v381_v44 = vmax.f32 %v278_v37, 0.0 }
 0x116   :  { %v281_v40 = vpop.f32.mrf.mxu0  ;;  %757 = vmatmul.mubr.bf16.gmra.mxu1 %v424_v35 }
 0x117   :  { %v282_v41 = vadd.f32 %v281_v40, %v1593_v27  ;;  %v382_v42 = vmax.f32 %v280_v38, 0.0 }
 0x118   :  { %v285_v43 = vpop.f32.mrf.mxu0 }
 0x119   :  { %v383_v45 = vmax.f32 %v282_v41, 0.0  ;;  %v426_v49 = vpack.c.bf16 %v382_v42, %v380_v46  ;;  %v286_v53 = vadd.f32 %v285_v43, %v1596_v28 }
 0x11a   :  { %v287_v47 = vpop.f32.mrf.mxu0 }
 0x11b   :  { %v427_v48 = vpack.c.bf16 %v383_v45, %v381_v44  ;;  %v288_v51 = vadd.f32 %v287_v47, %v1593_v27  ;;  %v384_v60 = vmax.f32 %v286_v53, 0.0 }
 0x11c   :  { %v289_v50 = vpop.f32.mrf.mxu0 }
 0x11d   :  { %v290_v52 = vadd.f32 %v289_v50, %v1596_v28  ;;  %766 = vmatprep.mubr.bf16.mxu1 %v427_v48  ;;  %v385_v58 = vmax.f32 %v288_v51, 0.0 }
 0x11e   :  { %v291_v54 = vpop.f32.mrf.mxu0  ;;  %767 = vmatmul.mubr.bf16.gmra.mxu1 %v426_v49 }
 0x11f   :  { %v292_v55 = vadd.f32 %v291_v54, %v1593_v27  ;;  %v386_v56 = vmax.f32 %v290_v52, 0.0 }
 0x120   :  { %v295_v57 = vpop.f32.mrf.mxu0 }
 0x121   :  { %v387_v59 = vmax.f32 %v292_v55, 0.0  ;;  %v428_v63 = vpack.c.bf16 %v386_v56, %v384_v60  ;;  %v296_v3 = vadd.f32 %v295_v57, %v1596_v28 }
 0x122   :  { %v297_v61 = vpop.f32.mrf.mxu0 }
 0x123   :  { %v429_v62 = vpack.c.bf16 %v387_v59, %v385_v58  ;;  %v298_v1 = vadd.f32 %v297_v61, %v1593_v27  ;;  %v388_v11 = vmax.f32 %v296_v3, 0.0 }
 0x124   :  { %v299_v0 = vpop.f32.mrf.mxu0 }
 0x125   :  { %v300_v2 = vadd.f32 %v299_v0, %v1596_v28  ;;  %776 = vmatprep.mubr.bf16.mxu1 %v429_v62  ;;  %v389_v9 = vmax.f32 %v298_v1, 0.0 }
 0x126   :  { %v301_v4 = vpop.f32.mrf.mxu0  ;;  %777 = vmatmul.mubr.bf16.gmra.mxu1 %v428_v63 }
 0x127   :  { %v302_v6 = vadd.f32 %v301_v4, %v1593_v27  ;;  %v390_v7 = vmax.f32 %v300_v2, 0.0 }
 0x128   :  { %v305_v8 = vpop.f32.mrf.mxu0 }
 0x129   :  { %v391_v10 = vmax.f32 %v302_v6, 0.0  ;;  %v430_v14 = vpack.c.bf16 %v390_v7, %v388_v11  ;;  %v306_v18 = vadd.f32 %v305_v8, %v1596_v28 }
 0x12a   :  { %v307_v12 = vpop.f32.mrf.mxu0 }
 0x12b   :  { %v431_v13 = vpack.c.bf16 %v391_v10, %v389_v9  ;;  %v308_v16 = vadd.f32 %v307_v12, %v1593_v27  ;;  %v392_v26 = vmax.f32 %v306_v18, 0.0  ;;  %v472_v9 = vld [vmem:[%s1852_s4] sm:$0x3] }
 0x12c   :  { %v309_v15 = vpop.f32.mrf.mxu0  ;;  %v1666_v10 = vrot.slane %v472_v9, %v1587_v25 }
 0x12d   :  { %v310_v17 = vadd.f32 %v309_v15, %v1596_v28  ;;  %786 = vmatprep.mubr.bf16.mxu1 %v431_v13  ;;  %v393_v23 = vmax.f32 %v308_v16, 0.0 }
 0x12e   :  { %v311_v19 = vpop.f32.mrf.mxu0  ;;  %787 = vmatmul.mubr.bf16.gmra.mxu1 %v430_v14 }
 0x12f   :  { %v312_v20 = vadd.f32 %v311_v19, %v1593_v27  ;;  %v394_v21 = vmax.f32 %v310_v17, 0.0 }
 0x130   :  { %v315_v22 = vpop.f32.mrf.mxu0 }
 0x131   :  { %v395_v5 = vmax.f32 %v312_v20, 0.0  ;;  %v432_v31 = vpack.c.bf16 %v394_v21, %v392_v26  ;;  %v316_v35 = vadd.f32 %v315_v22, %v1596_v28 }
 0x132   :  { %v317_v29 = vpop.f32.mrf.mxu0 }
 0x133   :  { %v433_v30 = vpack.c.bf16 %v395_v5, %v393_v23  ;;  %v318_v33 = vadd.f32 %v317_v29, %v1593_v27  ;;  %v396_v42 = vmax.f32 %v316_v35, 0.0 }
 0x134   :  { %v319_v32 = vpop.f32.mrf.mxu0 }
 0x135   :  { %v320_v34 = vadd.f32 %v319_v32, %v1596_v28  ;;  %796 = vmatprep.mubr.bf16.mxu1 %v433_v30  ;;  %v397_v40 = vmax.f32 %v318_v33, 0.0 }
 0x136   :  { %v321_v36 = vpop.f32.mrf.mxu0  ;;  %797 = vmatmul.mubr.bf16.gmra.mxu1 %v432_v31 }
 0x137   :  { %v322_v37 = vadd.f32 %v321_v36, %v1593_v27  ;;  %v398_v38 = vmax.f32 %v320_v34, 0.0 }
 0x138   :  { %v325_v39 = vpop.f32.mrf.mxu0 }
 0x139   :  { %v399_v41 = vmax.f32 %v322_v37, 0.0  ;;  %v434_v45 = vpack.c.bf16 %v398_v38, %v396_v42  ;;  %v326_v49 = vadd.f32 %v325_v39, %v1596_v28 }
 0x13a   :  { %v327_v43 = vpop.f32.mrf.mxu0 }
 0x13b   :  { %v435_v44 = vpack.c.bf16 %v399_v41, %v397_v40  ;;  %v328_v47 = vadd.f32 %v327_v43, %v1593_v27  ;;  %v400_v56 = vmax.f32 %v326_v49, 0.0 }
 0x13c   :  { %v329_v46 = vpop.f32.mrf.mxu0 }
 0x13d   :  { %v330_v48 = vadd.f32 %v329_v46, %v1596_v28  ;;  %806 = vmatprep.mubr.bf16.mxu1 %v435_v44  ;;  %v401_v54 = vmax.f32 %v328_v47, 0.0 }
 0x13e   :  { %v331_v50 = vpop.f32.mrf.mxu0  ;;  %807 = vmatmul.mubr.bf16.gmra.mxu1 %v434_v45 }
 0x13f   :  { %v332_v51 = vadd.f32 %v331_v50, %v1593_v27  ;;  %v402_v52 = vmax.f32 %v330_v48, 0.0 }
 0x140   :  { %v335_v53 = vpop.f32.mrf.mxu0 }
 0x141   :  { %v403_v55 = vmax.f32 %v332_v51, 0.0  ;;  %v436_v59 = vpack.c.bf16 %v402_v52, %v400_v56  ;;  %v336_v63 = vadd.f32 %v335_v53, %v1596_v28 }
 0x142   :  { %v337_v57 = vpop.f32.mrf.mxu0 }
 0x143   :  { %v437_v58 = vpack.c.bf16 %v403_v55, %v401_v54  ;;  %v338_v61 = vadd.f32 %v337_v57, %v1593_v27  ;;  %v404_v6 = vmax.f32 %v336_v63, 0.0 }
 0x144   :  { %v339_v60 = vpop.f32.mrf.mxu0 }
 0x145   :  { %v340_v62 = vadd.f32 %v339_v60, %v1596_v28  ;;  %816 = vmatprep.mubr.bf16.mxu1 %v437_v58  ;;  %v405_v3 = vmax.f32 %v338_v61, 0.0  ;;  %v1669_v28 = vrot.slane %v472_v9, %v1585_v24 }
 0x146   :  { %v341_v0 = vpop.f32.mrf.mxu0  ;;  %817 = vmatmul.mubr.bf16.gmra.mxu1 %v436_v59 }
 0x147   :  { %v342_v1 = vadd.f32 %v341_v0, %v1593_v27  ;;  %v406_v2 = vmax.f32 %v340_v62, 0.0  ;;  %v901_v27 = vld [vmem:[%s1853_s5] sm:$0x3] }
 0x148   :  { %v1677_v16 = vrot.slane %v901_v27, %v1587_v25  ;;  %v1680_v17 = vrot.slane %v901_v27, %v1585_v24 }
 0x149   :  { %v407_v4 = vmax.f32 %v342_v1, 0.0  ;;  %v438_v8 = vpack.c.bf16 %v406_v2, %v404_v6 }
 0x14b   :  { %v439_v7 = vpack.c.bf16 %v407_v4, %v405_v3 }
 0x14d   :  { %826 = vmatprep.mubr.bf16.mxu1 %v439_v7 }
 0x14e   :  { %827 = vmatmul.mubr.bf16.gmra.mxu1 %v438_v8 }
 0x196   :  { %v678_v11 = vpop.f32.mrf.mxu0 }
 0x197   :  { %v679_v12 = vadd.f32 %v678_v11, %v1666_v10 }
 0x198   :  { %v680_v13 = vpop.f32.mrf.mxu0 }
 0x199   :  { %v837_v14 = vmax.f32 %v679_v12, 0.0  ;;  %v681_v15 = vadd.f32 %v680_v13, %v1669_v28 }
 0x19a   :  { %v682_v18 = vpop.f32.mrf.mxu0 }
 0x19b   :  { %v838_v19 = vmax.f32 %v681_v15, 0.0  ;;  %v683_v20 = vadd.f32 %v682_v18, %v1666_v10  ;;  %v913_v5 = vmul.f32 %v1677_v16, %v837_v14 }
 0x19c   :  { %v684_v21 = vpop.f32.mrf.mxu0 }
 0x19d   :  { %v839_v22 = vmax.f32 %v683_v20, 0.0  ;;  %v685_v23 = vadd.f32 %v684_v21, %v1669_v28  ;;  %v914_v26 = vmul.f32 %v1680_v17, %v838_v19 }
 0x19e   :  { %v688_v29 = vpop.f32.mrf.mxu0 }
 0x19f   :  { %v840_v30 = vmax.f32 %v685_v23, 0.0  ;;  %v689_v25 = vadd.f32 %v688_v29, %v1666_v10  ;;  %v977_v31 = vadd.f32 %v914_v26, %v913_v5  ;;  %v915_v24 = vmul.f32 %v1677_v16, %v839_v22 }
 0x1a0   :  { %v690_v32 = vpop.f32.mrf.mxu0 }
 0x1a1   :  { %v916_v33 = vmul.f32 %v1680_v17, %v840_v30  ;;  %v841_v34 = vmax.f32 %v689_v25, 0.0  ;;  %v691_v35 = vadd.f32 %v690_v32, %v1669_v28  ;;  %978 = vadd.xlane.f32.xlu0 %v977_v31 }
 0x1a2   :  { %v692_v36 = vpop.f32.mrf.mxu0 }
 0x1a3   :  { %v842_v37 = vmax.f32 %v691_v35, 0.0  ;;  %v693_v38 = vadd.f32 %v692_v36, %v1666_v10  ;;  %v980_v39 = vadd.f32 %v916_v33, %v915_v24  ;;  %v917_v43 = vmul.f32 %v1677_v16, %v841_v34 }
 0x1a4   :  { %v694_v40 = vpop.f32.mrf.mxu0 }
 0x1a5   :  { %v843_v41 = vmax.f32 %v693_v38, 0.0  ;;  %v695_v42 = vadd.f32 %v694_v40, %v1669_v28  ;;  %981 = vadd.xlane.f32.xlu0 %v980_v39  ;;  %v918_v44 = vmul.f32 %v1680_v17, %v842_v37 }
 0x1a6   :  { %v698_v45 = vpop.f32.mrf.mxu0 }
 0x1a7   :  { %v844_v46 = vmax.f32 %v695_v42, 0.0  ;;  %v699_v47 = vadd.f32 %v698_v45, %v1666_v10  ;;  %v983_v48 = vadd.f32 %v918_v44, %v917_v43  ;;  %v919_v50 = vmul.f32 %v1677_v16, %v843_v41 }
 0x1a8   :  { %v700_v49 = vpop.f32.mrf.mxu0 }
 0x1a9   :  { %v920_v51 = vmul.f32 %v1680_v17, %v844_v46  ;;  %v845_v52 = vmax.f32 %v699_v47, 0.0  ;;  %v701_v53 = vadd.f32 %v700_v49, %v1669_v28  ;;  %984 = vadd.xlane.f32.xlu1 %v983_v48 }
 0x1aa   :  { %v702_v54 = vpop.f32.mrf.mxu0 }
 0x1ab   :  { %v846_v55 = vmax.f32 %v701_v53, 0.0  ;;  %v703_v56 = vadd.f32 %v702_v54, %v1666_v10  ;;  %v986_v57 = vadd.f32 %v920_v51, %v919_v50  ;;  %v921_v59 = vmul.f32 %v1677_v16, %v845_v52 }
 0x1ac   :  { %v704_v58 = vpop.f32.mrf.mxu0 }
 0x1ad   :  { %v922_v60 = vmul.f32 %v1680_v17, %v846_v55  ;;  %v847_v61 = vmax.f32 %v703_v56, 0.0  ;;  %v705_v62 = vadd.f32 %v704_v58, %v1669_v28  ;;  %987 = vadd.xlane.f32.xlu1 %v986_v57 }
 0x1ae   :  { %v708_v63 = vpop.f32.mrf.mxu1 }
 0x1af   :  { %v848_v0 = vmax.f32 %v705_v62, 0.0  ;;  %v709_v1 = vadd.f32 %v708_v63, %v1666_v10  ;;  %v989_v2 = vadd.f32 %v922_v60, %v921_v59  ;;  %v923_v4 = vmul.f32 %v1677_v16, %v847_v61 }
 0x1b0   :  { %v710_v3 = vpop.f32.mrf.mxu1 }
 0x1b1   :  { %v924_v6 = vmul.f32 %v1680_v17, %v848_v0  ;;  %v849_v7 = vmax.f32 %v709_v1, 0.0  ;;  %v711_v8 = vadd.f32 %v710_v3, %v1669_v28  ;;  %990 = vadd.xlane.f32.xlu0 %v989_v2 }
 0x1b2   :  { %v712_v9 = vpop.f32.mrf.mxu1 }
 0x1b3   :  { %v850_v11 = vmax.f32 %v711_v8, 0.0  ;;  %v713_v27 = vadd.f32 %v712_v9, %v1666_v10  ;;  %v992_v12 = vadd.f32 %v924_v6, %v923_v4  ;;  %v925_v14 = vmul.f32 %v1677_v16, %v849_v7 }
 0x1b4   :  { %v714_v13 = vpop.f32.mrf.mxu1 }
 0x1b5   :  { %v926_v15 = vmul.f32 %v1680_v17, %v850_v11  ;;  %v851_v18 = vmax.f32 %v713_v27, 0.0  ;;  %v715_v19 = vadd.f32 %v714_v13, %v1669_v28  ;;  %993 = vadd.xlane.f32.xlu1 %v992_v12 }
 0x1b6   :  { %v718_v20 = vpop.f32.mrf.mxu1 }
 0x1b7   :  { %v852_v21 = vmax.f32 %v715_v19, 0.0  ;;  %v719_v22 = vadd.f32 %v718_v20, %v1666_v10  ;;  %v995_v23 = vadd.f32 %v926_v15, %v925_v14  ;;  %v927_v26 = vmul.f32 %v1677_v16, %v851_v18 }
 0x1b8   :  { %v720_v5 = vpop.f32.mrf.mxu1 }
 0x1b9   :  { %v928_v29 = vmul.f32 %v1680_v17, %v852_v21  ;;  %v853_v30 = vmax.f32 %v719_v22, 0.0  ;;  %v721_v25 = vadd.f32 %v720_v5, %v1669_v28  ;;  %996 = vadd.xlane.f32.xlu0 %v995_v23 }
 0x1ba   :  { %v722_v31 = vpop.f32.mrf.mxu1 }
 0x1bb   :  { %v854_v32 = vmax.f32 %v721_v25, 0.0  ;;  %v723_v24 = vadd.f32 %v722_v31, %v1666_v10  ;;  %v998_v33 = vadd.f32 %v928_v29, %v927_v26  ;;  %v929_v35 = vmul.f32 %v1677_v16, %v853_v30 }
 0x1bc   :  { %v724_v34 = vpop.f32.mrf.mxu1 }
 0x1bd   :  { %v930_v36 = vmul.f32 %v1680_v17, %v854_v32  ;;  %v855_v37 = vmax.f32 %v723_v24, 0.0  ;;  %v725_v38 = vadd.f32 %v724_v34, %v1669_v28  ;;  %999 = vadd.xlane.f32.xlu1 %v998_v33 }
 0x1be   :  { %v728_v39 = vpop.f32.mrf.mxu1 }
 0x1bf   :  { %v856_v40 = vmax.f32 %v725_v38, 0.0  ;;  %v729_v41 = vadd.f32 %v728_v39, %v1666_v10  ;;  %v1001_v42 = vadd.f32 %v930_v36, %v929_v35  ;;  %v931_v44 = vmul.f32 %v1677_v16, %v855_v37 }
 0x1c0   :  { %v730_v43 = vpop.f32.mrf.mxu1 }
 0x1c1   :  { %v932_v45 = vmul.f32 %v1680_v17, %v856_v40  ;;  %v857_v46 = vmax.f32 %v729_v41, 0.0  ;;  %v731_v47 = vadd.f32 %v730_v43, %v1669_v28  ;;  %1002 = vadd.xlane.f32.xlu0 %v1001_v42 }
 0x1c2   :  { %v732_v48 = vpop.f32.mrf.mxu1 }
 0x1c3   :  { %v858_v49 = vmax.f32 %v731_v47, 0.0  ;;  %v733_v50 = vadd.f32 %v732_v48, %v1666_v10  ;;  %v1004_v51 = vadd.f32 %v932_v45, %v931_v44  ;;  %v933_v53 = vmul.f32 %v1677_v16, %v857_v46 }
 0x1c4   :  { %v734_v52 = vpop.f32.mrf.mxu1 }
 0x1c5   :  { %v934_v54 = vmul.f32 %v1680_v17, %v858_v49  ;;  %v859_v55 = vmax.f32 %v733_v50, 0.0  ;;  %v735_v56 = vadd.f32 %v734_v52, %v1669_v28  ;;  %1005 = vadd.xlane.f32.xlu1 %v1004_v51 }
 0x1c6   :  { %v738_v57 = vpop.f32.mrf.mxu1 }
 0x1c7   :  { %v860_v58 = vmax.f32 %v735_v56, 0.0  ;;  %v739_v59 = vadd.f32 %v738_v57, %v1666_v10  ;;  %v1007_v60 = vadd.f32 %v934_v54, %v933_v53  ;;  %v935_v62 = vmul.f32 %v1677_v16, %v859_v55 }
 0x1c8   :  { %v740_v61 = vpop.f32.mrf.mxu1 }
 0x1c9   :  { %v936_v63 = vmul.f32 %v1680_v17, %v860_v58  ;;  %v861_v0 = vmax.f32 %v739_v59, 0.0  ;;  %v741_v1 = vadd.f32 %v740_v61, %v1669_v28  ;;  %1008 = vadd.xlane.f32.xlu0 %v1007_v60 }
 0x1ca   :  { %v742_v2 = vpop.f32.mrf.mxu1 }
 0x1cb   :  { %v862_v3 = vmax.f32 %v741_v1, 0.0  ;;  %v743_v4 = vadd.f32 %v742_v2, %v1666_v10  ;;  %v1010_v6 = vadd.f32 %v936_v63, %v935_v62  ;;  %v937_v8 = vmul.f32 %v1677_v16, %v861_v0 }
 0x1cc   :  { %v744_v7 = vpop.f32.mrf.mxu1 }
 0x1cd   :  { %v938_v9 = vmul.f32 %v1680_v17, %v862_v3  ;;  %v863_v11 = vmax.f32 %v743_v4, 0.0  ;;  %v745_v27 = vadd.f32 %v744_v7, %v1669_v28  ;;  %1011 = vadd.xlane.f32.xlu1 %v1010_v6 }
 0x1ce   :  { %v748_v12 = vpop.f32.mrf.mxu1 }
 0x1cf   :  { %v864_v13 = vmax.f32 %v745_v27, 0.0  ;;  %v749_v14 = vadd.f32 %v748_v12, %v1666_v10  ;;  %v1013_v15 = vadd.f32 %v938_v9, %v937_v8  ;;  %v939_v19 = vmul.f32 %v1677_v16, %v863_v11 }
 0x1d0   :  { %v750_v18 = vpop.f32.mrf.mxu1 }
 0x1d1   :  { %v940_v20 = vmul.f32 %v1680_v17, %v864_v13  ;;  %v865_v21 = vmax.f32 %v749_v14, 0.0  ;;  %v751_v22 = vadd.f32 %v750_v18, %v1669_v28  ;;  %1014 = vadd.xlane.f32.xlu0 %v1013_v15 }
 0x1d2   :  { %v752_v23 = vpop.f32.mrf.mxu1 }
 0x1d3   :  { %v866_v5 = vmax.f32 %v751_v22, 0.0  ;;  %v753_v26 = vadd.f32 %v752_v23, %v1666_v10  ;;  %v1016_v29 = vadd.f32 %v940_v20, %v939_v19  ;;  %v941_v25 = vmul.f32 %v1677_v16, %v865_v21 }
 0x1d4   :  { %v754_v30 = vpop.f32.mrf.mxu1 }
 0x1d5   :  { %v942_v31 = vmul.f32 %v1680_v17, %v866_v5  ;;  %v867_v32 = vmax.f32 %v753_v26, 0.0  ;;  %v755_v24 = vadd.f32 %v754_v30, %v1669_v28  ;;  %1017 = vadd.xlane.f32.xlu1 %v1016_v29 }
 0x1d6   :  { %v758_v33 = vpop.f32.mrf.mxu1 }
 0x1d7   :  { %v868_v34 = vmax.f32 %v755_v24, 0.0  ;;  %v759_v35 = vadd.f32 %v758_v33, %v1666_v10  ;;  %v1019_v36 = vadd.f32 %v942_v31, %v941_v25  ;;  %v943_v38 = vmul.f32 %v1677_v16, %v867_v32 }
 0x1d8   :  { %v760_v37 = vpop.f32.mrf.mxu1 }
 0x1d9   :  { %v944_v39 = vmul.f32 %v1680_v17, %v868_v34  ;;  %v869_v40 = vmax.f32 %v759_v35, 0.0  ;;  %v761_v41 = vadd.f32 %v760_v37, %v1669_v28  ;;  %1020 = vadd.xlane.f32.xlu0 %v1019_v36 }
 0x1da   :  { %v762_v42 = vpop.f32.mrf.mxu1 }
 0x1db   :  { %v870_v43 = vmax.f32 %v761_v41, 0.0  ;;  %v763_v44 = vadd.f32 %v762_v42, %v1666_v10  ;;  %v1022_v45 = vadd.f32 %v944_v39, %v943_v38  ;;  %v945_v47 = vmul.f32 %v1677_v16, %v869_v40 }
 0x1dc   :  { %v764_v46 = vpop.f32.mrf.mxu1 }
 0x1dd   :  { %v946_v48 = vmul.f32 %v1680_v17, %v870_v43  ;;  %v871_v49 = vmax.f32 %v763_v44, 0.0  ;;  %v765_v50 = vadd.f32 %v764_v46, %v1669_v28  ;;  %1023 = vadd.xlane.f32.xlu1 %v1022_v45 }
 0x1de   :  { %v768_v51 = vpop.f32.mrf.mxu1 }
 0x1df   :  { %v872_v52 = vmax.f32 %v765_v50, 0.0  ;;  %v769_v53 = vadd.f32 %v768_v51, %v1666_v10  ;;  %v1025_v54 = vadd.f32 %v946_v48, %v945_v47  ;;  %v947_v56 = vmul.f32 %v1677_v16, %v871_v49 }
 0x1e0   :  { %v770_v55 = vpop.f32.mrf.mxu1 }
 0x1e1   :  { %v948_v57 = vmul.f32 %v1680_v17, %v872_v52  ;;  %v873_v58 = vmax.f32 %v769_v53, 0.0  ;;  %v771_v59 = vadd.f32 %v770_v55, %v1669_v28  ;;  %1026 = vadd.xlane.f32.xlu0 %v1025_v54 }
 0x1e2   :  { %v772_v60 = vpop.f32.mrf.mxu1 }
 0x1e3   :  { %v874_v61 = vmax.f32 %v771_v59, 0.0  ;;  %v773_v62 = vadd.f32 %v772_v60, %v1666_v10  ;;  %v1028_v63 = vadd.f32 %v948_v57, %v947_v56  ;;  %v949_v1 = vmul.f32 %v1677_v16, %v873_v58 }
 0x1e4   :  { %v774_v0 = vpop.f32.mrf.mxu1 }
 0x1e5   :  { %v950_v2 = vmul.f32 %v1680_v17, %v874_v61  ;;  %v875_v3 = vmax.f32 %v773_v62, 0.0  ;;  %v775_v4 = vadd.f32 %v774_v0, %v1669_v28  ;;  %1029 = vadd.xlane.f32.xlu1 %v1028_v63 }
 0x1e6   :  { %v778_v6 = vpop.f32.mrf.mxu1 }
 0x1e7   :  { %v876_v7 = vmax.f32 %v775_v4, 0.0  ;;  %v779_v8 = vadd.f32 %v778_v6, %v1666_v10  ;;  %v1031_v9 = vadd.f32 %v950_v2, %v949_v1  ;;  %v951_v27 = vmul.f32 %v1677_v16, %v875_v3 }
 0x1e8   :  { %v780_v11 = vpop.f32.mrf.mxu1 }
 0x1e9   :  { %v952_v12 = vmul.f32 %v1680_v17, %v876_v7  ;;  %v877_v13 = vmax.f32 %v779_v8, 0.0  ;;  %v781_v14 = vadd.f32 %v780_v11, %v1669_v28  ;;  %1032 = vadd.xlane.f32.xlu0 %v1031_v9 }
 0x1ea   :  { %v782_v15 = vpop.f32.mrf.mxu1 }
 0x1eb   :  { %v878_v18 = vmax.f32 %v781_v14, 0.0  ;;  %v783_v19 = vadd.f32 %v782_v15, %v1666_v10  ;;  %v1034_v20 = vadd.f32 %v952_v12, %v951_v27  ;;  %v953_v22 = vmul.f32 %v1677_v16, %v877_v13 }
 0x1ec   :  { %v784_v21 = vpop.f32.mrf.mxu1 }
 0x1ed   :  { %v954_v23 = vmul.f32 %v1680_v17, %v878_v18  ;;  %v879_v5 = vmax.f32 %v783_v19, 0.0  ;;  %v785_v26 = vadd.f32 %v784_v21, %v1669_v28  ;;  %1035 = vadd.xlane.f32.xlu1 %v1034_v20 }
 0x1ee   :  { %v788_v29 = vpop.f32.mrf.mxu1 }
 0x1ef   :  { %v880_v30 = vmax.f32 %v785_v26, 0.0  ;;  %v789_v25 = vadd.f32 %v788_v29, %v1666_v10  ;;  %v1037_v31 = vadd.f32 %v954_v23, %v953_v22  ;;  %v955_v24 = vmul.f32 %v1677_v16, %v879_v5 }
 0x1f0   :  { %v790_v32 = vpop.f32.mrf.mxu1 }
 0x1f1   :  { %v956_v33 = vmul.f32 %v1680_v17, %v880_v30  ;;  %v881_v34 = vmax.f32 %v789_v25, 0.0  ;;  %v791_v35 = vadd.f32 %v790_v32, %v1669_v28  ;;  %1038 = vadd.xlane.f32.xlu0 %v1037_v31 }
 0x1f2   :  { %v792_v36 = vpop.f32.mrf.mxu1 }
 0x1f3   :  { %v882_v37 = vmax.f32 %v791_v35, 0.0  ;;  %v793_v38 = vadd.f32 %v792_v36, %v1666_v10  ;;  %v1040_v39 = vadd.f32 %v956_v33, %v955_v24  ;;  %v957_v41 = vmul.f32 %v1677_v16, %v881_v34 }
 0x1f4   :  { %v794_v40 = vpop.f32.mrf.mxu1 }
 0x1f5   :  { %v958_v42 = vmul.f32 %v1680_v17, %v882_v37  ;;  %v883_v43 = vmax.f32 %v793_v38, 0.0  ;;  %v795_v44 = vadd.f32 %v794_v40, %v1669_v28  ;;  %1041 = vadd.xlane.f32.xlu1 %v1040_v39 }
 0x1f6   :  { %v798_v45 = vpop.f32.mrf.mxu1 }
 0x1f7   :  { %v884_v46 = vmax.f32 %v795_v44, 0.0  ;;  %v799_v47 = vadd.f32 %v798_v45, %v1666_v10  ;;  %v1043_v48 = vadd.f32 %v958_v42, %v957_v41  ;;  %v959_v50 = vmul.f32 %v1677_v16, %v883_v43 }
 0x1f8   :  { %v800_v49 = vpop.f32.mrf.mxu1 }
 0x1f9   :  { %v960_v51 = vmul.f32 %v1680_v17, %v884_v46  ;;  %v885_v52 = vmax.f32 %v799_v47, 0.0  ;;  %v801_v53 = vadd.f32 %v800_v49, %v1669_v28  ;;  %1044 = vadd.xlane.f32.xlu0 %v1043_v48 }
 0x1fa   :  { %v802_v54 = vpop.f32.mrf.mxu1 }
 0x1fb   :  { %v886_v55 = vmax.f32 %v801_v53, 0.0  ;;  %v803_v56 = vadd.f32 %v802_v54, %v1666_v10  ;;  %v1046_v57 = vadd.f32 %v960_v51, %v959_v50  ;;  %v961_v59 = vmul.f32 %v1677_v16, %v885_v52 }
 0x1fc   :  { %v804_v58 = vpop.f32.mrf.mxu1 }
 0x1fd   :  { %v962_v60 = vmul.f32 %v1680_v17, %v886_v55  ;;  %v887_v61 = vmax.f32 %v803_v56, 0.0  ;;  %v805_v62 = vadd.f32 %v804_v58, %v1669_v28  ;;  %1047 = vadd.xlane.f32.xlu1 %v1046_v57 }
 0x1fe   :  { %v808_v63 = vpop.f32.mrf.mxu1 }
 0x1ff   :  { %v888_v0 = vmax.f32 %v805_v62, 0.0  ;;  %v809_v1 = vadd.f32 %v808_v63, %v1666_v10  ;;  %v1049_v2 = vadd.f32 %v962_v60, %v961_v59  ;;  %v963_v4 = vmul.f32 %v1677_v16, %v887_v61 }
 0x200   :  { %v810_v3 = vpop.f32.mrf.mxu1 }
 0x201   :  { %v964_v6 = vmul.f32 %v1680_v17, %v888_v0  ;;  %v889_v7 = vmax.f32 %v809_v1, 0.0  ;;  %v811_v8 = vadd.f32 %v810_v3, %v1669_v28  ;;  %1050 = vadd.xlane.f32.xlu0 %v1049_v2 }
 0x202   :  { %v812_v9 = vpop.f32.mrf.mxu1 }
 0x203   :  { %v890_v11 = vmax.f32 %v811_v8, 0.0  ;;  %v813_v27 = vadd.f32 %v812_v9, %v1666_v10  ;;  %v1052_v12 = vadd.f32 %v964_v6, %v963_v4  ;;  %v965_v14 = vmul.f32 %v1677_v16, %v889_v7 }
 0x204   :  { %v814_v13 = vpop.f32.mrf.mxu1 }
 0x205   :  { %v966_v15 = vmul.f32 %v1680_v17, %v890_v11  ;;  %v891_v18 = vmax.f32 %v813_v27, 0.0  ;;  %v815_v19 = vadd.f32 %v814_v13, %v1669_v28  ;;  %1053 = vadd.xlane.f32.xlu1 %v1052_v12 }
 0x206   :  { %v818_v20 = vpop.f32.mrf.mxu1 }
 0x207   :  { %v892_v21 = vmax.f32 %v815_v19, 0.0  ;;  %v819_v22 = vadd.f32 %v818_v20, %v1666_v10  ;;  %v1055_v23 = vadd.f32 %v966_v15, %v965_v14  ;;  %v967_v26 = vmul.f32 %v1677_v16, %v891_v18 }
 0x208   :  { %v820_v5 = vpop.f32.mrf.mxu1 }
 0x209   :  { %v968_v29 = vmul.f32 %v1680_v17, %v892_v21  ;;  %v893_v30 = vmax.f32 %v819_v22, 0.0  ;;  %v821_v25 = vadd.f32 %v820_v5, %v1669_v28  ;;  %1056 = vadd.xlane.f32.xlu0 %v1055_v23 }
 0x20a   :  { %v822_v31 = vpop.f32.mrf.mxu1 }
 0x20b   :  { %v894_v32 = vmax.f32 %v821_v25, 0.0  ;;  %v823_v24 = vadd.f32 %v822_v31, %v1666_v10  ;;  %v1058_v33 = vadd.f32 %v968_v29, %v967_v26  ;;  %v969_v35 = vmul.f32 %v1677_v16, %v893_v30 }
 0x20c   :  { %v824_v34 = vpop.f32.mrf.mxu1 }
 0x20d   :  { %v970_v36 = vmul.f32 %v1680_v17, %v894_v32  ;;  %v895_v37 = vmax.f32 %v823_v24, 0.0  ;;  %v825_v38 = vadd.f32 %v824_v34, %v1669_v28  ;;  %1059 = vadd.xlane.f32.xlu1 %v1058_v33 }
 0x20e   :  { %v828_v39 = vpop.f32.mrf.mxu1 }
 0x20f   :  { %v896_v40 = vmax.f32 %v825_v38, 0.0  ;;  %v829_v41 = vadd.f32 %v828_v39, %v1666_v10  ;;  %v1061_v42 = vadd.f32 %v970_v36, %v969_v35  ;;  %v971_v44 = vmul.f32 %v1677_v16, %v895_v37 }
 0x210   :  { %v830_v43 = vpop.f32.mrf.mxu1 }
 0x211   :  { %v972_v45 = vmul.f32 %v1680_v17, %v896_v40  ;;  %v897_v46 = vmax.f32 %v829_v41, 0.0  ;;  %v831_v47 = vadd.f32 %v830_v43, %v1669_v28  ;;  %1062 = vadd.xlane.f32.xlu0 %v1061_v42 }
 0x212   :  { %v832_v48 = vpop.f32.mrf.mxu1 }
 0x213   :  { %v898_v49 = vmax.f32 %v831_v47, 0.0  ;;  %v833_v50 = vadd.f32 %v832_v48, %v1666_v10  ;;  %v1064_v51 = vadd.f32 %v972_v45, %v971_v44  ;;  %v973_v53 = vmul.f32 %v1677_v16, %v897_v46 }
 0x214   :  { %v834_v52 = vpop.f32.mrf.mxu1  ;;  %v1811_v10 = vstv %s1854_s6  ;;  %s1315_s6 = smov [#allocation3]  }
 0x215   :  { %v974_v54 = vmul.f32 %v1680_v17, %v898_v49  ;;  %v899_v55 = vmax.f32 %v833_v50, 0.0  ;;  %v835_v56 = vadd.f32 %v834_v52, %v1669_v28  ;;  %1065 = vadd.xlane.f32.xlu1 %v1064_v51  ;;  %s1144_s13 = sshll.u32 %s1315_s6, 4  ;;  %s1145_s13 = int_to_ptr.vmem [resolvable:$true] %s1144_s13 }
 0x216   :  { %s1292_s14 = scalar_lea.vmem %s1145_s13, 4096  ;;  %p1297_p1 = scmp.lt.s32.totalorder %s1145_s13, %s1145_s13 }
 0x217   :  { %v900_v57 = vmax.f32 %v835_v56, 0.0  ;;  %v1067_v58 = vadd.f32 %v974_v54, %v973_v53  ;;  %v975_v59 = vmul.f32 %v1677_v16, %v899_v55  ;;  %p1293_p0 = scmp.ne.s32.totalorder %s1145_s13, %s1292_s14  ;;  %p1298_p2 = scmp.lt.s32.totalorder %s1292_s14, %s1292_s14 }
 0x219   :  { %v976_v60 = vmul.f32 %v1680_v17, %v900_v57  ;;  %1068 = vadd.xlane.f32.xlu0 %v1067_v58  ;;  %p1299_p3 = por %p1298_p2, %p1297_p1 }
 0x21b   :  { %v1070_v61 = vadd.f32 %v976_v60, %v975_v59  ;;  %p1300_p4 = pnand %p1299_p3, %p1293_p0 }
 0x21d   :  { %1071 = vadd.xlane.f32.xlu1 %v1070_v61 }
 0x22a   :  { %v979_v62 = vpop.xlane.xlu0 %978 }
 0x22b   :  { %v1075_v63 = vadd.f32 %v1811_v10, %v979_v62 }
 0x22d   :  { %1107 = vst [vmem:[#allocation3] sm:$0xff] %v1075_v63 }
 0x22e   :  { %v982_v28 = vpop.xlane.xlu0 %981 }
 0x22f   :  { %v1076_v0 = vadd.f32 %v1811_v10, %v982_v28 }
 0x231   :  { %1108 = vst [vmem:[#allocation3 + $0x8] sm:$0xff] %v1076_v0 }
 0x232   :  { %v985_v1 = vpop.xlane.xlu1 %984 }
 0x233   :  { %v1077_v16 = vadd.f32 %v1811_v10, %v985_v1 }
 0x235   :  { %1109 = vst [vmem:[#allocation3 + $0x10] sm:$0xff] %v1077_v16 }
 0x236   :  { %v988_v17 = vpop.xlane.xlu1 %987 }
 0x237   :  { %v1078_v2 = vadd.f32 %v1811_v10, %v988_v17 }
 0x239   :  { %1110 = vst [vmem:[#allocation3 + $0x18] sm:$0xff] %v1078_v2 }
 0x23a   :  { %v991_v3 = vpop.xlane.xlu0 %990 }
 0x23b   :  { %v1079_v4 = vadd.f32 %v1811_v10, %v991_v3 }
 0x23d   :  { %1111 = vst [vmem:[#allocation3 + $0x20] sm:$0xff] %v1079_v4 }
 0x23e   :  { %v994_v6 = vpop.xlane.xlu1 %993 }
 0x23f   :  { %v1080_v7 = vadd.f32 %v1811_v10, %v994_v6 }
 0x241   :  { %1112 = vst [vmem:[#allocation3 + $0x28] sm:$0xff] %v1080_v7 }
 0x242   :  { %v997_v8 = vpop.xlane.xlu0 %996 }
 0x243   :  { %v1081_v9 = vadd.f32 %v1811_v10, %v997_v8 }
 0x245   :  { %1113 = vst [vmem:[#allocation3 + $0x30] sm:$0xff] %v1081_v9 }
 0x246   :  { %v1000_v11 = vpop.xlane.xlu1 %999 }
 0x247   :  { %v1082_v27 = vadd.f32 %v1811_v10, %v1000_v11 }
 0x249   :  { %1114 = vst [vmem:[#allocation3 + $0x38] sm:$0xff] %v1082_v27 }
 0x24a   :  { %v1003_v12 = vpop.xlane.xlu0 %1002 }
 0x24b   :  { %v1083_v13 = vadd.f32 %v1811_v10, %v1003_v12 }
 0x24d   :  { %1115 = vst [vmem:[#allocation3 + $0x40] sm:$0xff] %v1083_v13 }
 0x24e   :  { %v1006_v14 = vpop.xlane.xlu1 %1005 }
 0x24f   :  { %v1084_v15 = vadd.f32 %v1811_v10, %v1006_v14 }
 0x251   :  { %1116 = vst [vmem:[#allocation3 + $0x48] sm:$0xff] %v1084_v15 }
 0x252   :  { %v1009_v18 = vpop.xlane.xlu0 %1008 }
 0x253   :  { %v1085_v19 = vadd.f32 %v1811_v10, %v1009_v18 }
 0x255   :  { %1117 = vst [vmem:[#allocation3 + $0x50] sm:$0xff] %v1085_v19 }
 0x256   :  { %v1012_v20 = vpop.xlane.xlu1 %1011 }
 0x257   :  { %v1086_v21 = vadd.f32 %v1811_v10, %v1012_v20 }
 0x259   :  { %1118 = vst [vmem:[#allocation3 + $0x58] sm:$0xff] %v1086_v21 }
 0x25a   :  { %v1015_v22 = vpop.xlane.xlu0 %1014 }
 0x25b   :  { %v1087_v23 = vadd.f32 %v1811_v10, %v1015_v22 }
 0x25d   :  { %1119 = vst [vmem:[#allocation3 + $0x60] sm:$0xff] %v1087_v23 }
 0x25e   :  { %v1018_v5 = vpop.xlane.xlu1 %1017 }
 0x25f   :  { %v1088_v26 = vadd.f32 %v1811_v10, %v1018_v5 }
 0x261   :  { %1120 = vst [vmem:[#allocation3 + $0x68] sm:$0xff] %v1088_v26 }
 0x262   :  { %v1021_v29 = vpop.xlane.xlu0 %1020 }
 0x263   :  { %v1089_v30 = vadd.f32 %v1811_v10, %v1021_v29 }
 0x265   :  { %1121 = vst [vmem:[#allocation3 + $0x70] sm:$0xff] %v1089_v30 }
 0x266   :  { %v1024_v25 = vpop.xlane.xlu1 %1023 }
 0x267   :  { %v1090_v31 = vadd.f32 %v1811_v10, %v1024_v25 }
 0x269   :  { %1122 = vst [vmem:[#allocation3 + $0x78] sm:$0xff] %v1090_v31 }
 0x26a   :  { %v1027_v32 = vpop.xlane.xlu0 %1026 }
 0x26b   :  { %v1091_v24 = vadd.f32 %v1811_v10, %v1027_v32 }
 0x26d   :  { %1123 = vst [vmem:[#allocation3 + $0x80] sm:$0xff] %v1091_v24 }
 0x26e   :  { %v1030_v33 = vpop.xlane.xlu1 %1029 }
 0x26f   :  { %v1092_v34 = vadd.f32 %v1811_v10, %v1030_v33 }
 0x271   :  { %1124 = vst [vmem:[#allocation3 + $0x88] sm:$0xff] %v1092_v34 }
 0x272   :  { %v1033_v35 = vpop.xlane.xlu0 %1032 }
 0x273   :  { %v1093_v36 = vadd.f32 %v1811_v10, %v1033_v35 }
 0x275   :  { %1125 = vst [vmem:[#allocation3 + $0x90] sm:$0xff] %v1093_v36 }
 0x276   :  { %v1036_v37 = vpop.xlane.xlu1 %1035 }
 0x277   :  { %v1094_v38 = vadd.f32 %v1811_v10, %v1036_v37 }
 0x279   :  { %1126 = vst [vmem:[#allocation3 + $0x98] sm:$0xff] %v1094_v38 }
 0x27a   :  { %v1039_v39 = vpop.xlane.xlu0 %1038 }
 0x27b   :  { %v1095_v40 = vadd.f32 %v1811_v10, %v1039_v39 }
 0x27d   :  { %1127 = vst [vmem:[#allocation3 + $0xa0] sm:$0xff] %v1095_v40 }
 0x27e   :  { %v1042_v41 = vpop.xlane.xlu1 %1041 }
 0x27f   :  { %v1096_v42 = vadd.f32 %v1811_v10, %v1042_v41 }
 0x281   :  { %1128 = vst [vmem:[#allocation3 + $0xa8] sm:$0xff] %v1096_v42 }
 0x282   :  { %v1045_v43 = vpop.xlane.xlu0 %1044 }
 0x283   :  { %v1097_v44 = vadd.f32 %v1811_v10, %v1045_v43 }
 0x285   :  { %1129 = vst [vmem:[#allocation3 + $0xb0] sm:$0xff] %v1097_v44 }
 0x286   :  { %v1048_v45 = vpop.xlane.xlu1 %1047 }
 0x287   :  { %v1098_v46 = vadd.f32 %v1811_v10, %v1048_v45 }
 0x289   :  { %1130 = vst [vmem:[#allocation3 + $0xb8] sm:$0xff] %v1098_v46 }
 0x28a   :  { %v1051_v47 = vpop.xlane.xlu0 %1050 }
 0x28b   :  { %v1099_v48 = vadd.f32 %v1811_v10, %v1051_v47 }
 0x28d   :  { %1131 = vst [vmem:[#allocation3 + $0xc0] sm:$0xff] %v1099_v48 }
 0x28e   :  { %v1054_v49 = vpop.xlane.xlu1 %1053 }
 0x28f   :  { %v1100_v50 = vadd.f32 %v1811_v10, %v1054_v49 }
 0x291   :  { %1132 = vst [vmem:[#allocation3 + $0xc8] sm:$0xff] %v1100_v50 }
 0x292   :  { %v1057_v51 = vpop.xlane.xlu0 %1056 }
 0x293   :  { %v1101_v52 = vadd.f32 %v1811_v10, %v1057_v51 }
 0x295   :  { %1133 = vst [vmem:[#allocation3 + $0xd0] sm:$0xff] %v1101_v52 }
 0x296   :  { %v1060_v53 = vpop.xlane.xlu1 %1059 }
 0x297   :  { %v1102_v54 = vadd.f32 %v1811_v10, %v1060_v53 }
 0x299   :  { %1134 = vst [vmem:[#allocation3 + $0xd8] sm:$0xff] %v1102_v54 }
 0x29a   :  { %v1063_v55 = vpop.xlane.xlu0 %1062 }
 0x29b   :  { %v1103_v56 = vadd.f32 %v1811_v10, %v1063_v55 }
 0x29d   :  { %1135 = vst [vmem:[#allocation3 + $0xe0] sm:$0xff] %v1103_v56 }
 0x29e   :  { %v1066_v57 = vpop.xlane.xlu1 %1065 }
 0x29f   :  { %v1104_v58 = vadd.f32 %v1811_v10, %v1066_v57 }
 0x2a1   :  { %1136 = vst [vmem:[#allocation3 + $0xe8] sm:$0xff] %v1104_v58 }
 0x2a2   :  { %v1069_v59 = vpop.xlane.xlu0 %1068 }
 0x2a3   :  { %v1105_v60 = vadd.f32 %v1811_v10, %v1069_v59 }
 0x2a5   :  { %1137 = vst [vmem:[#allocation3 + $0xf0] sm:$0xff] %v1105_v60 }
 0x2a6   :  { %v1072_v61 = vpop.xlane.xlu1 %1071 }
 0x2a7   :  { %v1106_v62 = vadd.f32 %v1811_v10, %v1072_v61 }
 0x2a9   :  { %1138 = vst [vmem:[#allocation3 + $0xf8] sm:$0xff] %v1106_v62 }
 0x2aa   :  { %1303 = shalt.err (!%p1300_p4)
}
 0x2ab   :  { %s1316_s15 = smov 128   ;;  %s1317_s16 = smov 8  }
 0x2ac   :  { %1150 = dma.vmem_to_hbm [thread:$0]  %s1145_s13, 4096, %s1855_s7, [#allocation4], %s1316_s15, %s1316_s15, %s1317_s16  }
 0x2ad   :  { %1312 = dma.done.wait [#allocation4], 4096  }
 0x2ae   :  { %1313 = vsyncadd [#allocation4], 4294963200 }
 0x2af   :  { %1154 = vsyncpa [#allocation4], 1 }

</bundles_post_ra>
